<compile_context>
chip_gen: v7x
topology: tpu7x:2x2x1
jax: 0.10.0
libtpu: 0.0.40
codegen_flags: <defaults>
</compile_context>

<pallas_src>
import functools
import math

import jax
import jax.numpy as jnp
from jax.experimental import pallas as pl
from jax.experimental.pallas import tpu as pltpu


def make_positional_encoding(d_model, max_len=20, dtype=jnp.float32):
    """Deterministically build the PE buffer, same formula as the PyTorch module."""
    position = jnp.arange(max_len, dtype=jnp.float32)[:, None]            # (max_len, 1)
    div_term = jnp.exp(
        jnp.arange(0, d_model, 2, dtype=jnp.float32) * (-(math.log(10000.0) / d_model))
    )                                                                     # (d_model//2,)
    ang = position * div_term                                             # (max_len, d_model//2)
    pe = jnp.zeros((max_len, d_model), dtype=jnp.float32)
    pe = pe.at[:, 0::2].set(jnp.sin(ang))
    pe = pe.at[:, 1::2].set(jnp.cos(ang))
    return pe.astype(dtype)


# ----------------------------- kernels ---------------------------------------


def _pe_add_kernel(x_ref, pe_ref, o_ref):
    # x_ref: (bB, bR), pe_ref: (1, bR) -> broadcasts over the batch rows.
    o_ref[...] = x_ref[...] + pe_ref[...]


def _hash_u32(x):
    """splitmix32-style finalizer on uint32 arrays (VPU bit ops + wrapping mul)."""
    x = x ^ (x >> 16)
    x = x * jnp.uint32(0x7FEB352D)
    x = x ^ (x >> 15)
    x = x * jnp.uint32(0x846CA68B)
    x = x ^ (x >> 16)
    return x


def _pe_add_dropout_kernel(seed_ref, x_ref, pe_ref, o_ref, *, thr, scale, row, bB, bR):
    """Add PE then inverted dropout; mask from a stateless counter hash.

    Drop probability = thr / 2**24; survivors scaled by `scale` = 1/(1-p).
    The hash is keyed on (seed, global element index) so the result is identical
    regardless of the tiling (grid-invariant sampling).
    """
    y = x_ref[...] + pe_ref[...]
    i = pl.program_id(0)
    j = pl.program_id(1)
    rows = (jax.lax.broadcasted_iota(jnp.int32, y.shape, 0) + i * bB).astype(jnp.uint32)
    cols = (jax.lax.broadcasted_iota(jnp.int32, y.shape, 1) + j * bR).astype(jnp.uint32)
    ctr = rows * jnp.uint32(row) + cols
    s = seed_ref[0].astype(jnp.uint32)
    h = _hash_u32(ctr ^ (s * jnp.uint32(0x9E3779B9) + jnp.uint32(0x85EBCA6B)))
    keep = (h & jnp.uint32(0x00FFFFFF)) >= jnp.uint32(thr)
    o_ref[...] = jnp.where(keep, y * jnp.asarray(scale, y.dtype),
                           jnp.zeros((), y.dtype))


# ----------------------------- wrapper ----------------------------------------


def _tpu_vmem_capacity(default_bytes=64 << 20):
    """Physical VMEM per core; conservative (v7x) fallback if query unavailable."""
    try:
        return int(pltpu.get_tpu_info().vmem_capacity_bytes)
    except Exception:
        return default_bytes


def _choose_blocks(B, row, itemsize, target_bytes):
    """Pick a (bB, bR) block for the (B, row) array.

    Rules: bB is a multiple of 8 or == B; bR is a multiple of 128 or == row;
    block bytes ~ target_bytes; >= 2 grid steps for non-trivial inputs (megacore).
    """
    # Lane-axis chunk of the folded row.
    sub_rows = B if B <= 8 else 8
    per_row_budget = max(128 * itemsize, target_bytes // sub_rows)
    if row * itemsize <= per_row_budget or row <= 128:
        bR = row
    else:
        bR = max(128, (per_row_budget // itemsize) // 128 * 128)
        bR = min(bR, row)

    # Batch fold (sublane axis).
    if bR == row:
        fit = max(1, target_bytes // (row * itemsize))
        if fit >= B:
            bB = B
        else:
            bB = min(max(8, (fit // 8) * 8), B)
    else:
        bB = sub_rows

    # v7x megacore: prefer >= 2 grid steps when the input is non-trivial.
    if bB >= B and bR >= row and B * row * itemsize >= (1 << 20):
        if B >= 16:
            bB = max(8, ((B // 2) // 8) * 8)
        elif row >= 256:
            bR = max(128, ((row // 2) // 128) * 128)
    return bB, bR


def positional_encoding_forward(x, pe, *, dropout_rate=0.1, training=False, seed=0):
    """x: (B, S, D); pe: (max_len, D) with S <= max_len."""
    B, S, D = x.shape
    dtype = x.dtype
    pe_s = pe[:S, :].astype(dtype)                # match dtype (no in-kernel cast)

    # Lane-dense layout: fold (S, D) into one long row.
    row = S * D
    x2 = x.reshape(B, row)
    pe2 = pe_s.reshape(1, row)

    itemsize = jnp.dtype(dtype).itemsize
    vmem_cap = _tpu_vmem_capacity()
    vmem_limit = int(min(max(vmem_cap * 3 // 4, 32 << 20), 96 << 20))
    target_block_bytes = (8 << 20) if vmem_cap >= (100 << 20) else (4 << 20)

    bB, bR = _choose_blocks(B, row, itemsize, target_block_bytes)
    grid = (pl.cdiv(B, bB), pl.cdiv(row, bR))

    compiler_params = pltpu.CompilerParams(
        dimension_semantics=("parallel", "parallel"),  # all tiles independent
        vmem_limit_bytes=vmem_limit,
    )
    out_shape = jax.ShapeDtypeStruct((B, row), dtype)
    io_bytes = 2 * B * row * itemsize + row * itemsize   # read x + write out (+ pe)

    if (not training) or dropout_rate <= 0.0:
        # Eval mode / p=0: dropout is identity -> just the elementwise add.
        out2 = pl.pallas_call(
            _pe_add_kernel,
            out_shape=out_shape,
            grid_spec=pltpu.PrefetchScalarGridSpec(
                num_scalar_prefetch=0,
                grid=grid,
                in_specs=[
                    pl.BlockSpec((bB, bR), lambda i, j: (i, j)),
                    pl.BlockSpec((1, bR), lambda i, j: (0, j)),
                ],
                out_specs=pl.BlockSpec((bB, bR), lambda i, j: (i, j)),
            ),
            compiler_params=compiler_params,
            cost_estimate=pl.CostEstimate(flops=B * row, transcendentals=0,
                                          bytes_accessed=io_bytes),
        )(x2, pe2)
        return out2.reshape(B, S, D)

    if dropout_rate >= 1.0:
        # PyTorch nn.Dropout(p=1.0) zeroes everything (and 1/(1-p) is undefined).
        return jnp.zeros_like(x)

    # Training mode: add + inverted dropout with a stateless per-element hash.
    thr = int(round(float(dropout_rate) * (1 << 24)))     # drop if hash24 < thr
    thr = max(0, min(thr, (1 << 24) - 1))
    scale = 1.0 / (1.0 - float(dropout_rate))
    seed_arr = jnp.asarray([seed], dtype=jnp.int32)
    kernel = functools.partial(_pe_add_dropout_kernel, thr=thr, scale=scale,
                               row=row, bB=bB, bR=bR)

    out2 = pl.pallas_call(
        kernel,
        out_shape=out_shape,
        grid_spec=pltpu.PrefetchScalarGridSpec(
            num_scalar_prefetch=1,
            grid=grid,
            in_specs=[
                pl.BlockSpec((bB, bR), lambda i, j, seed_ref: (i, j)),
                pl.BlockSpec((1, bR), lambda i, j, seed_ref: (0, j)),
            ],
            out_specs=pl.BlockSpec((bB, bR), lambda i, j, seed_ref: (i, j)),
        ),
        compiler_params=compiler_params,
        cost_estimate=pl.CostEstimate(flops=8 * B * row, transcendentals=0,
                                      bytes_accessed=io_bytes),
    )(seed_arr, x2, pe2)
    return out2.reshape(B, S, D)


if __name__ == "__main__":
    B, S, D = 2, 8, 32          # batch, seq_len, d_model  (S <= max_len=20)
    MAX_LEN = 20
    DROPOUT = 0.1

    key = jax.random.PRNGKey(0)
    x = jax.random.normal(key, (B, S, D), dtype=jnp.float32)
    pe = make_positional_encoding(D, max_len=MAX_LEN, dtype=jnp.float32)

    # Eval-mode forward (dropout == identity), matching module.eval() semantics.
    out = positional_encoding_forward(x, pe, dropout_rate=DROPOUT, training=False)
    out = jax.block_until_ready(out)

    ref = x + pe[None, :S, :]
    assert out.shape == (B, S, D)
    assert jnp.allclose(out, ref, atol=1e-6, rtol=1e-6), "mismatch vs reference (eval)"

    # Training-mode forward: every element must be either 0 (dropped) or ref/(1-p).
    out_tr = positional_encoding_forward(
        x, pe, dropout_rate=DROPOUT, training=True, seed=123
    )
    out_tr = jax.block_until_ready(out_tr)
    scale = 1.0 / (1.0 - DROPOUT)
    is_kept = jnp.isclose(out_tr, ref * scale, atol=1e-5, rtol=1e-5)
    is_dropped = jnp.isclose(out_tr, 0.0, atol=1e-6)
    assert out_tr.shape == (B, S, D)
    assert bool(jnp.all(is_kept | is_dropped)), "mismatch vs reference (training/dropout)"
    drop_frac = float(jnp.mean(is_dropped.astype(jnp.float32)))
    assert 0.01 <= drop_frac <= 0.35, f"dropout fraction {drop_frac} far from p={DROPOUT}"

    print("KERNEL_OK")
</pallas_src>

<mosaic_0001>
module attributes {stable_mosaic.version = 11 : i64} {
  func.func @_pe_add_kernel(%arg0: i32, %arg1: i32, %arg2: memref<2x256xf32, #tpu.memory_space<vmem>>, %arg3: memref<1x256xf32, #tpu.memory_space<vmem>>, %arg4: memref<2x256xf32, #tpu.memory_space<vmem>>) attributes {dimension_semantics = [#tpu.dimension_semantics<parallel>, #tpu.dimension_semantics<parallel>], iteration_bounds = array<i64: 1, 1>, scalar_prefetch = 0 : i64, scratch_operands = 0 : i64, tpu.core_type = #tpu.core_type<tc>, window_params = [{transform_indices = @transform_0, window_bounds = array<i64: 2, 256>}, {transform_indices = @transform_1, window_bounds = array<i64: 1, 256>}, {transform_indices = @transform_2, window_bounds = array<i64: 2, 256>}]} {
    %c0 = arith.constant 0 : index
    %c0_0 = arith.constant 0 : index
    %0 = vector.load %arg2[%c0, %c0_0] : memref<2x256xf32, #tpu.memory_space<vmem>>, vector<2x256xf32>
    %c0_1 = arith.constant 0 : index
    %c0_2 = arith.constant 0 : index
    %1 = vector.load %arg3[%c0_1, %c0_2] : memref<1x256xf32, #tpu.memory_space<vmem>>, vector<1x256xf32>
    %2 = vector.broadcast %1 : vector<1x256xf32> to vector<2x256xf32>
    %3 = arith.addf %0, %2 : vector<2x256xf32>
    %c0_3 = arith.constant 0 : index
    %c0_4 = arith.constant 0 : index
    %4 = vector.load %arg4[%c0_3, %c0_4] : memref<2x256xf32, #tpu.memory_space<vmem>>, vector<2x256xf32>
    tpu.vector_store %arg4[%c0_3, %c0_4], %3 {strides = array<i32>} : memref<2x256xf32, #tpu.memory_space<vmem>>, vector<2x256xf32>,
    return
  }
  func.func @transform_0(%arg0: i32, %arg1: i32) -> (i32, i32) {
    %c0_i32 = arith.constant 0 : i32
    return %arg0, %arg1 : i32, i32
  }
  func.func @transform_1(%arg0: i32, %arg1: i32) -> (i32, i32) {
    %c0_i32 = arith.constant 0 : i32
    %c0_i32_0 = arith.constant 0 : i32
    return %c0_i32, %arg1 : i32, i32
  }
  func.func @transform_2(%arg0: i32, %arg1: i32) -> (i32, i32) {
    %c0_i32 = arith.constant 0 : i32
    return %arg0, %arg1 : i32, i32
  }
}

</mosaic_0001>

<bundles_post_ra>
// kernel: tpu_custom_call.1
= control target key start
LH: loop header
LB: loop body
LE: loop exit
PB: predicated region body
PF: predicated region fallthrough
CT: control target
= control target key end

     0   :  { %7 = vsyncpa [#allocation3], 0  ;;  %s157_s0 = inlined_call_operand.hbm [shape: f32[2,256], index: 0, kind: input, shape index: {}]   ;;  %s158_s1 = inlined_call_operand.vmem [shape: f32[1,256], index: 1, kind: input, shape index: {}]   ;;  %s159_s2 = inlined_call_operand.hbm [shape: f32[2,256], index: 2, kind: output, shape index: {}]  }
   0x1   :  { %8 = vsyncpa [#allocation4], 0  ;;  %s112_s9 = smov [#allocation2]   ;;  %s64_s13 = scalar_lea.hbm %s157_s0, 64 }
   0x2   :  { %s15_s10 = sshll.u32 %s112_s9, 4  ;;  %p65_p0 = scmp.ne.s32.totalorder %s157_s0, %s64_s13  ;;  %s16_s10 = int_to_ptr.vmem [resolvable:$true] %s15_s10 }
   0x3   :  { %p68_p1 = scmp.lt.u32.totalorder %s64_s13, %s157_s0 }
   0x5   :  { %p70_p2 = pnand %p68_p1, %p65_p0 }
   0x7   :  { %73 = shalt.err (!%p70_p2)
}
   0x8   :  { %s74_s18 = scalar_lea.vmem %s16_s10, 64  ;;  %p79_p4 = scmp.lt.s32.totalorder %s16_s10, %s16_s10 }
   0x9   :  { %p75_p3 = scmp.ne.s32.totalorder %s16_s10, %s74_s18  ;;  %p80_p5 = scmp.lt.s32.totalorder %s74_s18, %s74_s18 }
   0xb   :  { %p81_p6 = por %p80_p5, %p79_p4 }
   0xd   :  { %p82_p7 = pnand %p81_p6, %p75_p3 }
   0xf   :  { %85 = shalt.err (!%p82_p7)
}
  0x10   :  { %18 = dma.hbm_to_vmem [thread:$0]  %s157_s0, 64, %s16_s10, [#allocation3]  }
  0x11   :  { %108 = dma.done.wait [#allocation3], 64  }
  0x12   :  { %109 = vsyncadd [#allocation3], 4294967232  ;;  %v27_v0 = vlaneseq  ;;  %v113_v1 = vmov 1983009808   ;;  %v25_v7 = vld [vmem:[%s158_s1] sm:$0x3] }
  0x13   :  { %v37_v2 = vunpack.c.l.s4 %v113_v1  ;;  %v24_v12 = vld [vmem:[#allocation2] sm:$0xf]  ;;  %s114_s23 = smov [#allocation5]  }
  0x14   :  { %v28_v3 = vshrl.u32 %v27_v0, 7  ;;  %s52_s0 = sshll.u32 %s114_s23, 4  ;;  %s53_s0 = int_to_ptr.vmem [resolvable:$true] %s52_s0 }
  0x15   :  { %v38_v6 = vunpack.c.0.s8 %v37_v2  ;;  %s86_s24 = scalar_lea.vmem %s53_s0, 64  ;;  %p91_p9 = scmp.lt.s32.totalorder %s53_s0, %s53_s0 }
  0x16   :  { %v29_v4 = vsub.s32 0, %v28_v3  ;;  %v33_v5 = vsub.s32 1, %v28_v3  ;;  %p87_p8 = scmp.ne.s32.totalorder %s53_s0, %s86_s24  ;;  %p92_p10 = scmp.lt.s32.totalorder %s86_s24, %s86_s24 }
  0x17   :  { %v41_v10 = vsub.s32 %v38_v6, %v28_v3 }
  0x18   :  { %v30_v8 = vrot.slane %v25_v7, %v29_v4  ;;  %v34_v9 = vrot.slane %v25_v7, %v33_v5  ;;  %p93_p11 = por %p92_p10, %p91_p9 }
  0x1a   :  { %v35_v11 = vcombine.low %v30_v8, %v34_v9  ;;  %p94_p12 = pnand %p93_p11, %p87_p8 }
  0x1c   :  { %v42_v13 = vrot.slane %v35_v11, %v41_v10 }
  0x1e   :  { %v44_v14 = vadd.f32 %v42_v13, %v24_v12 }
  0x20   :  { %45 = vst [vmem:[#allocation5] sm:$0xf] %v44_v14 }
  0x21   :  { %97 = shalt.err (!%p94_p12)
}
  0x22   :  { %s98_s26 = scalar_lea.hbm %s159_s2, 64 }
  0x23   :  { %p99_p13 = scmp.ne.s32.totalorder %s159_s2, %s98_s26  ;;  %p102_p0 = scmp.lt.u32.totalorder %s98_s26, %s159_s2 }
  0x25   :  { %p104_p1 = pnand %p102_p0, %p99_p13 }
  0x27   :  { %107 = shalt.err (!%p104_p1)
}
  0x28   :  { %55 = dma.vmem_to_hbm [thread:$0]  %s53_s0, 64, %s159_s2, [#allocation4]  }
  0x29   :  { %110 = dma.done.wait [#allocation4], 64  }
  0x2a   :  { %111 = vsyncadd [#allocation4], 4294967232 }
  0x2b   :  { %59 = vsyncpa [#allocation3], 1 }
  0x2c   :  { %60 = vsyncpa [#allocation4], 1 }

</bundles_post_ra>
